<compile_context>
chip_gen: v7x
topology: tpu7x:2x2x1
jax: 0.10.0
libtpu: 0.0.40
codegen_flags: <defaults>
</compile_context>

<pallas_src>
import functools

import jax
import jax.numpy as jnp
import numpy as np
from jax import lax
from jax.experimental import pallas as pl
from jax.experimental.pallas import tpu as pltpu


def _shifted_tap(tile, halo, d, pad):
    """Return shifted[:, l] == tile[:, l + d], splicing halo columns at the
    tile boundary. Lane-aligned: roll (XLU) + iota-mask select (VPU)."""
    if d == 0:
        return tile
    _, TL = tile.shape
    r = pltpu.roll(tile, (-d) % TL, axis=1)                  # XLU lane rotate
    lane = lax.broadcasted_iota(jnp.int32, (1, TL), 1)
    if d < 0:                                                # fix lanes [0, -d)
        for i in range(-d):
            c0 = pad + i + d
            col = halo[:, c0:c0 + 1]                         # (C, 1)
            r = jnp.where(lane == i, col, r)
    else:                                                    # fix lanes [TL-d, TL)
        for i in range(d):
            c0 = pad + i
            col = halo[:, c0:c0 + 1]
            r = jnp.where(lane == TL - d + i, col, r)
    return r


def _passcell_kernel(x_ref, h_ref, oprev_ref, hx_ref, hh_ref, w_ref, b_ref,
                     o_out_ref, h_out_ref, *, kernel_size):
    K = kernel_size
    pad = K // 2
    x_t = x_ref[0]                                           # (Cxp, TL)
    h_t = h_ref[0]                                           # (H,   TL)

    if pad > 0:
        ji = pl.program_id(1)
        hx = hx_ref[0, ji]                                   # (Cxp, 2*pad) resident
        hh = hh_ref[0, ji]                                   # (H,   2*pad) resident
    else:
        hx = hh = None

    # im2col: K taps, each an aligned [x_shift ; h_shift] sublane block.
    pieces = []
    for t in range(K):
        d = t - pad
        pieces.append(_shifted_tap(x_t, hx, d, pad))
        pieces.append(_shifted_tap(h_t, hh, d, pad))
    im2col = jnp.concatenate(pieces, axis=0)                 # (K*(Cxp+H), TL)

    acc = jnp.dot(w_ref[...], im2col, preferred_element_type=jnp.float32)
    acc = acc + b_ref[...]                                   # (4H, TL), f32

    o_prev = oprev_ref[0].astype(jnp.float32)
    H = o_prev.shape[0]
    f = jax.nn.sigmoid(acc[0 * H:1 * H])
    i = jax.nn.sigmoid(acc[1 * H:2 * H])
    k = jax.nn.sigmoid(acc[2 * H:3 * H])
    g = jax.nn.sigmoid(acc[3 * H:4 * H])
    o_new = f * o_prev - i * jnp.maximum(g, 0.0)
    h_new = k * jnp.maximum(o_new, 0.0)
    o_out_ref[0] = o_new.astype(o_out_ref.dtype)             # lane-dense stores
    h_out_ref[0] = h_new.astype(h_out_ref.dtype)


def _round_up(v, m):
    return -(-v // m) * m


def _choose_tile(L, B, tl, tl_max=1024):
    """Length tile: multiple of 128 dividing L, <= tl_max, and (when B == 1)
    leave >= 2 grid steps so both v7x TensorCores / megacore stay busy."""
    if tl is not None:
        assert L % tl == 0 and tl % 128 == 0, "tl must be a 128-mult dividing L"
        return tl
    target = min(tl_max, L)
    if B == 1 and L >= 256:
        target = min(target, max(128, (L // 2) // 128 * 128))
    t = (target // 128) * 128
    while L % t:
        t -= 128
    return t


def conv1d_passcell_1(x, cur_state, weight, bias, kernel_size, *,
                      tl=None, mxu_dtype=None):
    """Pallas TPU implementation of Conv1d_PASScell_1.forward.

    x          : (B, input_dim, L)  NCL, like the PyTorch module
    cur_state  : (o, h), each (B, hidden_dim, L)
    weight     : (4*hidden_dim, input_dim + hidden_dim, kernel_size)
    bias       : (4*hidden_dim,) or None
    tl         : optional length tile (128-multiple). Default: up to 1024.
    mxu_dtype  : optional MXU-operand dtype (e.g. jnp.bfloat16 on v6e/v7x).
                 Opt-in; accumulation and gate math always stay in f32.
    returns    : (y, (o, h)) in NCL layout
    """
    o_prev, h_prev = cur_state
    B, Cin, L = x.shape
    H = h_prev.shape[1]
    K = int(kernel_size)
    # TODO(synk): even kernel_size unsupported -- PyTorch Conv1d with
    # padding=K//2 emits L+1 outputs for even K ('same' length only for odd K).
    assert K % 2 == 1, "kernel_size must be odd"
    pad = K // 2

    if bias is None:
        bias = jnp.zeros((4 * H,), jnp.float32)

    op_dtype = x.dtype if mxu_dtype is None else jnp.dtype(mxu_dtype)
    pack = {4: 8, 2: 16, 1: 32}.get(jnp.dtype(op_dtype).itemsize, 8)
    Cxp = _round_up(Cin, pack)
    out_dtype = x.dtype

    # Replicate-pad the length up to a multiple of 128 (matches the module's
    # 'replicate' padding; padded columns are sliced off the outputs).
    L_orig = L
    Lp = _round_up(L, 128)
    if Lp != L:
        ext = ((0, 0), (0, 0), (0, Lp - L))
        x = jnp.pad(x, ext, mode="edge")
        h_prev = jnp.pad(h_prev, ext, mode="edge")
        o_prev = jnp.pad(o_prev, ext, mode="edge")
        L = Lp
    tl = _choose_tile(L, B, tl)
    NT = L // tl

    # ---- operands (channel-first; no comb materialization in HBM) ----------
    x_p = x
    if Cxp != Cin:
        x_p = jnp.pad(x_p, ((0, 0), (0, Cxp - Cin), (0, 0)))
    x_p = x_p.astype(op_dtype)
    h_op = h_prev.astype(op_dtype)

    CpT = Cxp + H
    w_x = weight[:, :Cin, :]
    w_h = weight[:, Cin:, :]
    if Cxp != Cin:
        w_x = jnp.pad(w_x, ((0, 0), (0, Cxp - Cin), (0, 0)))
    w_cat = jnp.concatenate([w_x, w_h], axis=1)              # (4H, CpT, K)
    w_fused = jnp.transpose(w_cat, (0, 2, 1)).reshape(4 * H, K * CpT)
    w_fused = w_fused.astype(op_dtype)
    b_col = bias.astype(jnp.float32).reshape(4 * H, 1)

    # ---- tiny per-tile halo columns (resident per batch inside the kernel) -
    hw = max(2 * pad, 1)
    if pad > 0:
        off = np.concatenate([np.arange(-pad, 0), np.arange(tl, tl + pad)])
        idx = np.clip(np.arange(NT)[:, None] * tl + off[None, :], 0, L - 1)
        idx = jnp.asarray(idx.reshape(-1).astype(np.int32))

        def halo_of(a):                                      # (B,C,L)->(B,NT,C,2p)
            g = jnp.take(a, idx, axis=2)
            return (g.reshape(a.shape[0], a.shape[1], NT, 2 * pad)
                     .transpose(0, 2, 1, 3))

        halo_x = halo_of(x_p)
        halo_h = halo_of(h_op)
    else:
        halo_x = jnp.zeros((B, NT, Cxp, hw), op_dtype)
        halo_h = jnp.zeros((B, NT, H, hw), op_dtype)

    out_shape = (jax.ShapeDtypeStruct((B, H, L), out_dtype),
                 jax.ShapeDtypeStruct((B, H, L), out_dtype))
    in_specs = [
        pl.BlockSpec((1, Cxp, tl), lambda b, j: (b, 0, j)),          # x tile
        pl.BlockSpec((1, H, tl), lambda b, j: (b, 0, j)),            # h tile
        pl.BlockSpec((1, H, tl), lambda b, j: (b, 0, j)),            # o_prev tile
        pl.BlockSpec((1, NT, Cxp, hw), lambda b, j: (b, 0, 0, 0)),   # halo_x (resident)
        pl.BlockSpec((1, NT, H, hw), lambda b, j: (b, 0, 0, 0)),     # halo_h (resident)
        pl.BlockSpec((4 * H, K * CpT), lambda b, j: (0, 0)),         # fused weight
        pl.BlockSpec((4 * H, 1), lambda b, j: (0, 0)),               # bias column
    ]
    out_specs = (pl.BlockSpec((1, H, tl), lambda b, j: (b, 0, j)),
                 pl.BlockSpec((1, H, tl), lambda b, j: (b, 0, j)))

    o_new, h_new = pl.pallas_call(
        functools.partial(_passcell_kernel, kernel_size=K),
        out_shape=out_shape,
        grid=(B, NT),
        in_specs=in_specs,
        out_specs=out_specs,
        compiler_params=pltpu.CompilerParams(
            dimension_semantics=("parallel", "parallel")),
    )(x_p, h_op, o_prev, halo_x, halo_h, w_fused, b_col)

    if L != L_orig:
        o_new = o_new[:, :, :L_orig]
        h_new = h_new[:, :, :L_orig]
    return o_new, (o_new, h_new)


def _reference(x, cur_state, weight, bias, kernel_size):
    """Pure-JAX reference matching the PyTorch forward (for validation)."""
    o_prev, h_prev = cur_state
    pad = kernel_size // 2
    comb = jnp.concatenate([x, h_prev], axis=1)
    comb_p = jnp.pad(comb, ((0, 0), (0, 0), (pad, pad)), mode="edge")
    cl = lax.conv_general_dilated(
        comb_p, weight, window_strides=(1,), padding="VALID",
        dimension_numbers=("NCH", "OIH", "NCH"),
    ) + bias[None, :, None]
    cc_f, cc_i, cc_k, cc_g = jnp.split(cl, 4, axis=1)
    f = jax.nn.sigmoid(cc_f)
    i = jax.nn.sigmoid(cc_i)
    k = jax.nn.sigmoid(cc_k)
    g = jax.nn.sigmoid(cc_g)
    o = f * o_prev - i * jnp.maximum(g, 0.0)
    h = k * jnp.maximum(o, 0.0)
    return o, (o, h)


if __name__ == "__main__":
    def _run_case(B, Cin, H, L, K, tl=None, mxu_dtype=None,
                  rtol=2e-4, atol=2e-4):
        key = jax.random.PRNGKey(0)
        kx, ko, kh, kw, kb = jax.random.split(key, 5)
        x = jax.random.normal(kx, (B, Cin, L), dtype=jnp.float32)
        o0 = jax.random.normal(ko, (B, H, L), dtype=jnp.float32)
        h0 = jax.random.normal(kh, (B, H, L), dtype=jnp.float32)
        C = Cin + H
        bound = 1.0 / np.sqrt(C * K)          # nn.Conv1d default init range
        w = jax.random.uniform(kw, (4 * H, C, K), minval=-bound, maxval=bound,
                               dtype=jnp.float32)
        b = jax.random.uniform(kb, (4 * H,), minval=-bound, maxval=bound,
                               dtype=jnp.float32)

        fn = jax.jit(functools.partial(conv1d_passcell_1, kernel_size=K,
                                       tl=tl, mxu_dtype=mxu_dtype))
        y, (o_new, h_new) = fn(x, (o0, h0), w, b)
        jax.block_until_ready((y, o_new, h_new))

        y_ref, (o_ref, h_ref) = _reference(x, (o0, h0), w, b, K)
        np.testing.assert_allclose(np.asarray(y), np.asarray(y_ref),
                                   rtol=rtol, atol=atol)
        np.testing.assert_allclose(np.asarray(o_new), np.asarray(o_ref),
                                   rtol=rtol, atol=atol)
        np.testing.assert_allclose(np.asarray(h_new), np.asarray(h_ref),
                                   rtol=rtol, atol=atol)

    # module-consistent small shapes: batch=2, input_dim=4, hidden=32, L=16, K=3
    # (L is replicate-padded to 128 internally and sliced back)
    _run_case(B=2, Cin=4, H=32, L=16, K=3)
    # multi-tile path: 128-column tiles -> interior (cross-tile) halos exercised
    _run_case(B=2, Cin=4, H=32, L=256, K=3, tl=128)
    # opt-in bf16 MXU operands (v6e/v7x fast path); accumulation/gates stay f32
    _run_case(B=2, Cin=4, H=32, L=256, K=3, tl=128,
              mxu_dtype=jnp.bfloat16, rtol=5e-2, atol=5e-2)

    print("KERNEL_OK")
</pallas_src>

<mosaic_0001>
module attributes {stable_mosaic.version = 11 : i64} {
  func.func @_passcell_kernel(%arg0: i32, %arg1: i32, %arg2: memref<1x8x128xf32, #tpu.memory_space<vmem>>, %arg3: memref<1x32x128xf32, #tpu.memory_space<vmem>>, %arg4: memref<1x32x128xf32, #tpu.memory_space<vmem>>, %arg5: memref<1x1x8x2xf32, #tpu.memory_space<vmem>>, %arg6: memref<1x1x32x2xf32, #tpu.memory_space<vmem>>, %arg7: memref<128x120xf32, #tpu.memory_space<vmem>>, %arg8: memref<128x1xf32, #tpu.memory_space<vmem>>, %arg9: memref<1x32x128xf32, #tpu.memory_space<vmem>>, %arg10: memref<1x32x128xf32, #tpu.memory_space<vmem>>) attributes {dimension_semantics = [#tpu.dimension_semantics<parallel>, #tpu.dimension_semantics<parallel>], iteration_bounds = array<i64: 2, 1>, scalar_prefetch = 0 : i64, scratch_operands = 0 : i64, tpu.core_type = #tpu.core_type<tc>, window_params = [{transform_indices = @transform_0, window_bounds = array<i64: 1, 8, 128>}, {transform_indices = @transform_1, window_bounds = array<i64: 1, 32, 128>}, {transform_indices = @transform_2, window_bounds = array<i64: 1, 32, 128>}, {transform_indices = @transform_3, window_bounds = array<i64: 1, 1, 8, 2>}, {transform_indices = @transform_4, window_bounds = array<i64: 1, 1, 32, 2>}, {pipeline_mode = #tpu.pipeline_mode<synchronous>, transform_indices = @transform_5, window_bounds = array<i64: 128, 120>}, {pipeline_mode = #tpu.pipeline_mode<synchronous>, transform_indices = @transform_6, window_bounds = array<i64: 128, 1>}, {transform_indices = @transform_7, window_bounds = array<i64: 1, 32, 128>}, {transform_indices = @transform_8, window_bounds = array<i64: 1, 32, 128>}]} {
    %c0 = arith.constant 0 : index
    %c0_0 = arith.constant 0 : index
    %c0_1 = arith.constant 0 : index
    %0 = vector.load %arg2[%c0, %c0_0, %c0_1] : memref<1x8x128xf32, #tpu.memory_space<vmem>>, vector<1x8x128xf32>
    %1 = vector.shape_cast %0 : vector<1x8x128xf32> to vector<8x128xf32>
    %c0_2 = arith.constant 0 : index
    %c0_3 = arith.constant 0 : index
    %c0_4 = arith.constant 0 : index
    %2 = vector.load %arg3[%c0_2, %c0_3, %c0_4] : memref<1x32x128xf32, #tpu.memory_space<vmem>>, vector<1x32x128xf32>
    %3 = vector.shape_cast %2 : vector<1x32x128xf32> to vector<32x128xf32>
    %c0_5 = arith.constant 0 : index
    %4 = arith.index_cast %arg1 : i32 to index
    %c0_6 = arith.constant 0 : index
    %c0_7 = arith.constant 0 : index
    %5 = vector.load %arg5[%c0_5, %4, %c0_6, %c0_7] : memref<1x1x8x2xf32, #tpu.memory_space<vmem>>, vector<1x1x8x2xf32>
    %6 = vector.shape_cast %5 : vector<1x1x8x2xf32> to vector<8x2xf32>
    %c0_8 = arith.constant 0 : index
    %7 = arith.index_cast %arg1 : i32 to index
    %c0_9 = arith.constant 0 : index
    %c0_10 = arith.constant 0 : index
    %8 = vector.load %arg6[%c0_8, %7, %c0_9, %c0_10] : memref<1x1x32x2xf32, #tpu.memory_space<vmem>>, vector<1x1x32x2xf32>
    %9 = vector.shape_cast %8 : vector<1x1x32x2xf32> to vector<32x2xf32>
    %c1_i32 = arith.constant 1 : i32
    %10 = tpu.dynamic_rotate %1 by %c1_i32 dim 1 : vector<8x128xf32>, i32 -> vector<8x128xf32>
    %11 = tpu.iota {dimensions = array<i32: 1>} : vector<1x128xi32>
    %12 = vector.extract_strided_slice %6 {offsets = [0, 0], sizes = [8, 1], strides = [1, 1]} : vector<8x2xf32> to vector<8x1xf32>
    %c0_i32 = arith.constant 0 : i32
    %13 = vector.broadcast %c0_i32 : i32 to vector<1x128xi32>
    %14 = arith.cmpi eq, %11, %13 : vector<1x128xi32>
    %15 = vector.shape_cast %14 : vector<1x128xi1> to vector<1x128xi1>
    %16 = vector.broadcast %15 : vector<1x128xi1> to vector<8x128xi1>
    %17 = vector.shape_cast %12 : vector<8x1xf32> to vector<8x1xf32>
    %18 = vector.broadcast %17 : vector<8x1xf32> to vector<8x128xf32>
    %19 = arith.select %16, %18, %10 : vector<8x128xi1>, vector<8x128xf32>
    %c1_i32_11 = arith.constant 1 : i32
    %20 = tpu.dynamic_rotate %3 by %c1_i32_11 dim 1 : vector<32x128xf32>, i32 -> vector<32x128xf32>
    %21 = tpu.iota {dimensions = array<i32: 1>} : vector<1x128xi32>
    %22 = vector.extract_strided_slice %9 {offsets = [0, 0], sizes = [32, 1], strides = [1, 1]} : vector<32x2xf32> to vector<32x1xf32>
    %c0_i32_12 = arith.constant 0 : i32
    %23 = vector.broadcast %c0_i32_12 : i32 to vector<1x128xi32>
    %24 = arith.cmpi eq, %21, %23 : vector<1x128xi32>
    %25 = vector.shape_cast %24 : vector<1x128xi1> to vector<1x128xi1>
    %26 = vector.broadcast %25 : vector<1x128xi1> to vector<32x128xi1>
    %27 = vector.shape_cast %22 : vector<32x1xf32> to vector<32x1xf32>
    %28 = vector.broadcast %27 : vector<32x1xf32> to vector<32x128xf32>
    %29 = arith.select %26, %28, %20 : vector<32x128xi1>, vector<32x128xf32>
    %c127_i32 = arith.constant 127 : i32
    %30 = tpu.dynamic_rotate %1 by %c127_i32 dim 1 : vector<8x128xf32>, i32 -> vector<8x128xf32>
    %31 = tpu.iota {dimensions = array<i32: 1>} : vector<1x128xi32>
    %32 = vector.extract_strided_slice %6 {offsets = [0, 1], sizes = [8, 1], strides = [1, 1]} : vector<8x2xf32> to vector<8x1xf32>
    %c127_i32_13 = arith.constant 127 : i32
    %33 = vector.broadcast %c127_i32_13 : i32 to vector<1x128xi32>
    %34 = arith.cmpi eq, %31, %33 : vector<1x128xi32>
    %35 = vector.shape_cast %34 : vector<1x128xi1> to vector<1x128xi1>
    %36 = vector.broadcast %35 : vector<1x128xi1> to vector<8x128xi1>
    %37 = vector.shape_cast %32 : vector<8x1xf32> to vector<8x1xf32>
    %38 = vector.broadcast %37 : vector<8x1xf32> to vector<8x128xf32>
    %39 = arith.select %36, %38, %30 : vector<8x128xi1>, vector<8x128xf32>
    %c127_i32_14 = arith.constant 127 : i32
    %40 = tpu.dynamic_rotate %3 by %c127_i32_14 dim 1 : vector<32x128xf32>, i32 -> vector<32x128xf32>
    %41 = tpu.iota {dimensions = array<i32: 1>} : vector<1x128xi32>
    %42 = vector.extract_strided_slice %9 {offsets = [0, 1], sizes = [32, 1], strides = [1, 1]} : vector<32x2xf32> to vector<32x1xf32>
    %c127_i32_15 = arith.constant 127 : i32
    %43 = vector.broadcast %c127_i32_15 : i32 to vector<1x128xi32>
    %44 = arith.cmpi eq, %41, %43 : vector<1x128xi32>
    %45 = vector.shape_cast %44 : vector<1x128xi1> to vector<1x128xi1>
    %46 = vector.broadcast %45 : vector<1x128xi1> to vector<32x128xi1>
    %47 = vector.shape_cast %42 : vector<32x1xf32> to vector<32x1xf32>
    %48 = vector.broadcast %47 : vector<32x1xf32> to vector<32x128xf32>
    %49 = arith.select %46, %48, %40 : vector<32x128xi1>, vector<32x128xf32>
    %50 = tpu.concatenate %19, %29, %1, %3, %39, %49 in 0 : vector<8x128xf32>, vector<32x128xf32>, vector<8x128xf32>, vector<32x128xf32>, vector<8x128xf32>, vector<32x128xf32> -> vector<120x128xf32>
    %c0_16 = arith.constant 0 : index
    %c0_17 = arith.constant 0 : index
    %51 = vector.load %arg7[%c0_16, %c0_17] : memref<128x120xf32, #tpu.memory_space<vmem>>, vector<128x120xf32>
    %cst = arith.constant dense<0.000000e+00> : vector<128x128xf32>
    %52 = tpu.matmul %51, %50, %cst {dimension_numbers = #tpu.dot_dimension_numbers<[1], [0], [0], [1], [0, 0, 1, 1], [], []>} : vector<128x120xf32>, vector<120x128xf32>, vector<128x128xf32> -> vector<128x128xf32>
    %c0_18 = arith.constant 0 : index
    %c0_19 = arith.constant 0 : index
    %53 = vector.load %arg8[%c0_18, %c0_19] : memref<128x1xf32, #tpu.memory_space<vmem>>, vector<128x1xf32>
    %54 = vector.broadcast %53 : vector<128x1xf32> to vector<128x128xf32>
    %55 = arith.addf %52, %54 : vector<128x128xf32>
    %c0_20 = arith.constant 0 : index
    %c0_21 = arith.constant 0 : index
    %c0_22 = arith.constant 0 : index
    %56 = vector.load %arg4[%c0_20, %c0_21, %c0_22] : memref<1x32x128xf32, #tpu.memory_space<vmem>>, vector<1x32x128xf32>
    %57 = vector.shape_cast %56 : vector<1x32x128xf32> to vector<32x128xf32>
    %58 = vector.extract_strided_slice %55 {offsets = [0, 0], sizes = [32, 128], strides = [1, 1]} : vector<128x128xf32> to vector<32x128xf32>
    %59 = arith.negf %58 : vector<32x128xf32>
    %60 = math.exp %59 : vector<32x128xf32>
    %cst_23 = arith.constant 1.000000e+00 : f32
    %61 = vector.broadcast %cst_23 : f32 to vector<32x128xf32>
    %62 = arith.addf %61, %60 : vector<32x128xf32>
    %63 = arith.divf %61, %62 : vector<32x128xf32>
    %64 = vector.extract_strided_slice %55 {offsets = [32, 0], sizes = [32, 128], strides = [1, 1]} : vector<128x128xf32> to vector<32x128xf32>
    %65 = arith.negf %64 : vector<32x128xf32>
    %66 = math.exp %65 : vector<32x128xf32>
    %cst_24 = arith.constant 1.000000e+00 : f32
    %67 = vector.broadcast %cst_24 : f32 to vector<32x128xf32>
    %68 = arith.addf %67, %66 : vector<32x128xf32>
    %69 = arith.divf %67, %68 : vector<32x128xf32>
    %70 = vector.extract_strided_slice %55 {offsets = [64, 0], sizes = [32, 128], strides = [1, 1]} : vector<128x128xf32> to vector<32x128xf32>
    %71 = arith.negf %70 : vector<32x128xf32>
    %72 = math.exp %71 : vector<32x128xf32>
    %cst_25 = arith.constant 1.000000e+00 : f32
    %73 = vector.broadcast %cst_25 : f32 to vector<32x128xf32>
    %74 = arith.addf %73, %72 : vector<32x128xf32>
    %75 = arith.divf %73, %74 : vector<32x128xf32>
    %76 = vector.extract_strided_slice %55 {offsets = [96, 0], sizes = [32, 128], strides = [1, 1]} : vector<128x128xf32> to vector<32x128xf32>
    %77 = arith.negf %76 : vector<32x128xf32>
    %78 = math.exp %77 : vector<32x128xf32>
    %cst_26 = arith.constant 1.000000e+00 : f32
    %79 = vector.broadcast %cst_26 : f32 to vector<32x128xf32>
    %80 = arith.addf %79, %78 : vector<32x128xf32>
    %81 = arith.divf %79, %80 : vector<32x128xf32>
    %82 = arith.mulf %63, %57 : vector<32x128xf32>
    %cst_27 = arith.constant 0.000000e+00 : f32
    %83 = vector.broadcast %cst_27 : f32 to vector<32x128xf32>
    %84 = arith.maximumf %81, %83 : vector<32x128xf32>
    %85 = arith.mulf %69, %84 : vector<32x128xf32>
    %86 = arith.subf %82, %85 : vector<32x128xf32>
    %cst_28 = arith.constant 0.000000e+00 : f32
    %87 = vector.broadcast %cst_28 : f32 to vector<32x128xf32>
    %88 = arith.maximumf %86, %87 : vector<32x128xf32>
    %89 = arith.mulf %75, %88 : vector<32x128xf32>
    %c0_29 = arith.constant 0 : index
    %c0_30 = arith.constant 0 : index
    %c0_31 = arith.constant 0 : index
    %90 = vector.load %arg9[%c0_29, %c0_30, %c0_31] : memref<1x32x128xf32, #tpu.memory_space<vmem>>, vector<1x32x128xf32>
    %91 = vector.shape_cast %90 : vector<1x32x128xf32> to vector<32x128xf32>
    %92 = vector.shape_cast %86 : vector<32x128xf32> to vector<1x32x128xf32>
    tpu.vector_store %arg9[%c0_29, %c0_30, %c0_31], %92 {strides = array<i32>} : memref<1x32x128xf32, #tpu.memory_space<vmem>>, vector<1x32x128xf32>,
    %c0_32 = arith.constant 0 : index
    %c0_33 = arith.constant 0 : index
    %c0_34 = arith.constant 0 : index
    %93 = vector.load %arg10[%c0_32, %c0_33, %c0_34] : memref<1x32x128xf32, #tpu.memory_space<vmem>>, vector<1x32x128xf32>
    %94 = vector.shape_cast %93 : vector<1x32x128xf32> to vector<32x128xf32>
    %95 = vector.shape_cast %89 : vector<32x128xf32> to vector<1x32x128xf32>
    tpu.vector_store %arg10[%c0_32, %c0_33, %c0_34], %95 {strides = array<i32>} : memref<1x32x128xf32, #tpu.memory_space<vmem>>, vector<1x32x128xf32>,
    return
  }
  func.func @transform_0(%arg0: i32, %arg1: i32) -> (i32, i32, i32) {
    %c0_i32 = arith.constant 0 : i32
    %c0_i32_0 = arith.constant 0 : i32
    return %arg0, %c0_i32, %arg1 : i32, i32, i32
  }
  func.func @transform_1(%arg0: i32, %arg1: i32) -> (i32, i32, i32) {
    %c0_i32 = arith.constant 0 : i32
    %c0_i32_0 = arith.constant 0 : i32
    return %arg0, %c0_i32, %arg1 : i32, i32, i32
  }
  func.func @transform_2(%arg0: i32, %arg1: i32) -> (i32, i32, i32) {
    %c0_i32 = arith.constant 0 : i32
    %c0_i32_0 = arith.constant 0 : i32
    return %arg0, %c0_i32, %arg1 : i32, i32, i32
  }
  func.func @transform_3(%arg0: i32, %arg1: i32) -> (i32, i32, i32, i32) {
    %c0_i32 = arith.constant 0 : i32
    %c0_i32_0 = arith.constant 0 : i32
    %c0_i32_1 = arith.constant 0 : i32
    %c0_i32_2 = arith.constant 0 : i32
    return %arg0, %c0_i32, %c0_i32_0, %c0_i32_1 : i32, i32, i32, i32
  }
  func.func @transform_4(%arg0: i32, %arg1: i32) -> (i32, i32, i32, i32) {
    %c0_i32 = arith.constant 0 : i32
    %c0_i32_0 = arith.constant 0 : i32
    %c0_i32_1 = arith.constant 0 : i32
    %c0_i32_2 = arith.constant 0 : i32
    return %arg0, %c0_i32, %c0_i32_0, %c0_i32_1 : i32, i32, i32, i32
  }
  func.func @transform_5(%arg0: i32, %arg1: i32) -> (i32, i32) {
    %c0_i32 = arith.constant 0 : i32
    %c0_i32_0 = arith.constant 0 : i32
    %c0_i32_1 = arith.constant 0 : i32
    return %c0_i32, %c0_i32_0 : i32, i32
  }
  func.func @transform_6(%arg0: i32, %arg1: i32) -> (i32, i32) {
    %c0_i32 = arith.constant 0 : i32
    %c0_i32_0 = arith.constant 0 : i32
    %c0_i32_1 = arith.constant 0 : i32
    return %c0_i32, %c0_i32_0 : i32, i32
  }
  func.func @transform_7(%arg0: i32, %arg1: i32) -> (i32, i32, i32) {
    %c0_i32 = arith.constant 0 : i32
    %c0_i32_0 = arith.constant 0 : i32
    return %arg0, %c0_i32, %arg1 : i32, i32, i32
  }
  func.func @transform_8(%arg0: i32, %arg1: i32) -> (i32, i32, i32) {
    %c0_i32 = arith.constant 0 : i32
    %c0_i32_0 = arith.constant 0 : i32
    return %arg0, %c0_i32, %arg1 : i32, i32, i32
  }
}

</mosaic_0001>

<bundles_post_ra>
// kernel: conv1d_passcell_1.1
= control target key start
LH: loop header
LB: loop body
LE: loop exit
PB: predicated region body
PF: predicated region fallthrough
CT: control target
= control target key end

     0   :  { %s1576_s27 = smov 0   ;;  %s1578_s28 = smov 0   ;;  %s1813_s0 = inlined_call_operand.vmem [shape: f32[2,8,128], index: 0, kind: input, shape index: {}]   ;;  %s1814_s1 = inlined_call_operand.vmem [shape: f32[2,32,128], index: 1, kind: input, shape index: {}]   ;;  %s1815_s2 = inlined_call_operand.vmem [shape: f32[2,32,128], index: 2, kind: input, shape index: {}]   ;;  %s1816_s3 = inlined_call_operand.vmem [shape: f32[2,1,8,2], index: 3, kind: input, shape index: {}]   ;;  %s1817_s4 = inlined_call_operand.vmem [shape: f32[2,1,32,2], index: 4, kind: input, shape index: {}]   ;;  %s1818_s5 = inlined_call_operand.vmem [shape: f32[128,120], index: 5, kind: input, shape index: {}]   ;;  %s1819_s6 = inlined_call_operand.vmem [shape: f32[128,1], index: 6, kind: input, shape index: {}]   ;;  %s1820_s7 = inlined_call_operand.vmem [shape: f32[2,32,128], index: 7, kind: output, shape index: {0}]   ;;  %s1821_s8 = inlined_call_operand.vmem [shape: f32[2,32,128], index: 8, kind: output, shape index: {1}]  }
   0x1   :  { %s1580_s29 = smov 0  }
   0x2 LB: > { %s31_s30 = sadd.s32 1, %s1521_s28  ;;  %p1184_p0 = scmp.ge.s32.totalorder %s1525_s29, 1  ;;  %s1525_s29 = sphi %s1580_s29, %s19_s29   ;;  %s1521_s28 = sphi %s1578_s28, %s1823_s28   ;;  %s1517_s27 = sphi %s1576_s27, %s1822_s27  }
   0x3   : > { %p33_p1 = scmp.ge.s32.totalorder %s31_s30, 2  ;;  %p334_p2 = scmp.lt.s32.totalorder %s1525_s29, 3 }
   0x5   : > { %s1825_s30 = smov (%p33_p1, %s31_s30), 0  ;;  %p335_p3 = pnand %p1184_p0, %p334_p2 }
   0x6   : > { %p406_p4 = scmp.lt.s32.totalorder (!%p335_p3), %s1517_s27, 1  ;;  %v1527_v0 = vmov (!%p335_p3), 0   ;;  %s1528_s23 = smov (!%p335_p3), 1   ;;  %v1529_v17 = vmov (!%p335_p3), 1   ;;  %v551_v18 = vld [vmem:[%s1818_s5] sm:$0xff] (!%p335_p3)  ;;  %vm663_vm0 = vcmask (!%p335_p3), 982016   ;;  %v470_v36 = vlaneseq (!%p335_p3) }
   0x7   : > { %338 = sbr.rel (%p335_p3) target bundleno = 467 (0x1d3), region = 48  ;;  %1393 = vset.pattern.permute.xlu0 (!%p335_p3), %v1527_v0  ;;  %1409 = vset.pattern.permute.xlu1 (!%p335_p3), %v1527_v0  ;;  %s1530_s24 = smov (!%p335_p3), 127   ;;  %v559_v19 = vld [vmem:[%s1818_s5 + $0x40] sm:$0xff] (!%p335_p3)  ;;  %v580_v21 = vld [vmem:[%s1819_s6 + $0x68] sm:$0xff] (!%p335_p3)  ;;  %v581_v22 = vld [vmem:[%s1819_s6 + $0x70] sm:$0xff] (!%p335_p3) }
   0x8   : > { %1297 = vmatprep.mubr.msk.f32.mxu0 (!%p335_p3), %vm663_vm0, %v551_v18  ;;  %1309 = vmatprep.mubr.msk.f32.mxu1 (!%p335_p3), %vm663_vm0, %v559_v19  ;;  %v579_v20 = vld [vmem:[%s1819_s6 + $0x60] sm:$0xff] (!%p335_p3)  ;;  %v582_v24 = vld [vmem:[%s1819_s6 + $0x78] sm:$0xff] (!%p335_p3)  ;;  %v569_v25 = vld [vmem:[%s1819_s6 + $0x10] sm:$0xff] (!%p335_p3)  ;;  %v1673_v37 = vand.u32 (!%p335_p3), 127, %v470_v36 }
   0x9   : > { %v567_v23 = vld [vmem:[%s1819_s6] sm:$0xff] (!%p335_p3)  ;;  %v568_v26 = vld [vmem:[%s1819_s6 + $0x8] sm:$0xff] (!%p335_p3)  ;;  %v570_v28 = vld [vmem:[%s1819_s6 + $0x18] sm:$0xff] (!%p335_p3) }
   0xa   : > { %v571_v27 = vld [vmem:[%s1819_s6 + $0x20] sm:$0xff] (!%p335_p3)  ;;  %v573_v29 = vld [vmem:[%s1819_s6 + $0x30] sm:$0xff] (!%p335_p3)  ;;  %v572_v30 = vld [vmem:[%s1819_s6 + $0x28] sm:$0xff] (!%p335_p3)  ;;  %vm472_vm1 = vcmp.eq.s32.totalorder (!%p335_p3), %v1673_v37, 0  ;;  %vm515_vm2 = vcmp.eq.s32.totalorder (!%p335_p3), %v1673_v37, 127 }
   0xb   : > { %v575_v31 = vld [vmem:[%s1819_s6 + $0x40] sm:$0xff] (!%p335_p3)  ;;  %v574_v32 = vld [vmem:[%s1819_s6 + $0x38] sm:$0xff] (!%p335_p3)  ;;  %v577_v33 = vld [vmem:[%s1819_s6 + $0x50] sm:$0xff] (!%p335_p3) }
   0xc   : > { %v576_v34 = vld [vmem:[%s1819_s6 + $0x48] sm:$0xff] (!%p335_p3)  ;;  %v578_v35 = vld [vmem:[%s1819_s6 + $0x58] sm:$0xff] (!%p335_p3)  ;;  %v553_v19 = vld [vmem:[%s1818_s5 + $0x10] sm:$0xff] (!%p335_p3) }
   0xd   : > { %v552_v18 = vld [vmem:[%s1818_s5 + $0x8] sm:$0xff] (!%p335_p3) }
   0xe   : > { %s1827_s27 = smov (!%p406_p4, %s1517_s27), 1 }
   0xf   : > { %s1185_s9 = sshll.u32 %s1827_s27, 3  ;;  %s1594_s10 = sshll.u32 %s1827_s27, 5 }
  0x10   : > { %s432_s13 = scalar_lea.vmem %s1816_s3, %s1185_s9  ;;  %s437_s16 = scalar_lea.vmem %s1817_s4, %s1594_s10 }
  0x11   : > { %v461_v1 = vld [vmem:[%s432_s13] sm:$0xff]  ;;  %s412_s19 = scalar_lea.vmem %s1813_s0, %s1185_s9  ;;  %v465_v3 = vld [vmem:[%s437_s16 + $0x8] sm:$0xff]  ;;  %v466_v4 = vld [vmem:[%s437_s16 + $0x10] sm:$0xff]  ;;  %s420_s22 = scalar_lea.vmem %s1814_s1, %s1594_s10 }
  0x12   : > { %v464_v2 = vld [vmem:[%s437_s16] sm:$0xff]  ;;  %v456_v8 = vld [vmem:[%s420_s22 + $0x8] sm:$0xff]  ;;  %v1399_v11 = vpack.i.bf16 %v466_v4, %v465_v3  ;;  %v457_v12 = vld [vmem:[%s420_s22 + $0x10] sm:$0xff]  ;;  %s1795_s25 = scalar_lea.vmem %s1821_s8, %s1594_s10 }
  0x13   : > { %v1394_v5 = vpack.i.bf16 %v464_v2, %v461_v1  ;;  %v1610_v6 = vld [vmem:[%s412_s19] sm:$0xff]  ;;  %v458_v13 = vld [vmem:[%s420_s22 + $0x18] sm:$0xff]  ;;  %v1410_v16 = vpack.i.bf16 %v457_v12, %v456_v8  ;;  %s1774_s19 = scalar_lea.vmem %s1815_s2, %s1594_s10 }
  0x14   : > { %v455_v7 = vld [vmem:[%s420_s22] sm:$0xff]  ;;  %v1615_v14 = vpack.c.bf16 %v458_v13, %v457_v12  ;;  %v467_v15 = vld [vmem:[%s437_s16 + $0x18] sm:$0xff]  ;;  %s1788_s22 = scalar_lea.vmem %s1820_s7, %s1594_s10 }
  0x15   : > { %1395 = vperm.xlu0 %1393, %v1394_v5   ;;  %v1612_v9 = vpack.c.bf16 %v456_v8, %v455_v7  ;;  %v1404_v10 = vpack.i.bf16 %v455_v7, %v1610_v6 }
  0x17   : > { %1405 = vrot.lane.b32.xlu1 %v1404_v10, %s1528_s23 }
  0x19   : > { %1400 = vperm.xlu0 %1393, %v1399_v11  }
  0x1b   : > { %506 = vperm.xlu1 %1409, %v467_v15  }
  0x1d   : > { %1411 = vrot.lane.b32.xlu0 %v1410_v16, %s1528_s23 }
  0x1e   : > { %1415 = vset.pattern.permute.xlu0 %v1529_v17 }
  0x1f   : > { %487 = vrot.lane.b32.xlu1 %v458_v13, %s1528_s23 }
  0x20   : > { %1421 = vset.pattern.permute.xlu1 %v1529_v17 }
  0x21   : > { %1417 = vperm.xlu0 %1415, %v1394_v5  }
  0x23   : > { %1423 = vperm.xlu1 %1421, %v1399_v11  }
  0x25   : > { %544 = vperm.xlu0 %1415, %v467_v15  }
  0x27   : > { %1428 = vrot.lane.b32.xlu1 %v1404_v10, %s1530_s24 }
  0x28   : > { %1437 = vset.pattern.permute.xlu1 %v1527_v0 }
  0x29   : > { %529 = vrot.lane.b32.xlu0 %v458_v13, %s1530_s24 }
  0x2a   : > { %1438 = vset.pattern.permute.xlu0 %v1527_v0 }
  0x2b   : > { %1433 = vrot.lane.b32.xlu1 %v1410_v16, %s1530_s24 }
  0x2d   : > { %650 = vperm.xlu0 %1438, %v580_v21   ;;  %v554_v21 = vld [vmem:[%s1818_s5 + $0x18] sm:$0xff] }
  0x2f   : > { %645 = vperm.xlu1 %1437, %v579_v20   ;;  %v561_v20 = vld [vmem:[%s1818_s5 + $0x50] sm:$0xff] }
  0x31   : > { %585 = vperm.xlu0 %1438, %v567_v23   ;;  %v555_v23 = vld [vmem:[%s1818_s5 + $0x20] sm:$0xff] }
  0x33   : > { %655 = vperm.xlu1 %1437, %v581_v22   ;;  %v562_v22 = vld [vmem:[%s1818_s5 + $0x58] sm:$0xff] }
  0x35   : > { %595 = vperm.xlu0 %1438, %v569_v25   ;;  %v556_v25 = vld [vmem:[%s1818_s5 + $0x28] sm:$0xff] }
  0x37   : > { %660 = vperm.xlu1 %1437, %v582_v24   ;;  %v563_v24 = vld [vmem:[%s1818_s5 + $0x60] sm:$0xff] }
  0x39   : > { %605 = vperm.xlu0 %1438, %v571_v27   ;;  %v557_v27 = vld [vmem:[%s1818_s5 + $0x30] sm:$0xff] }
  0x3b   : > { %590 = vperm.xlu1 %1437, %v568_v26   ;;  %v564_v26 = vld [vmem:[%s1818_s5 + $0x68] sm:$0xff] }
  0x3d   : > { %615 = vperm.xlu0 %1438, %v573_v29   ;;  %v558_v29 = vld [vmem:[%s1818_s5 + $0x38] sm:$0xff] }
  0x3f   : > { %600 = vperm.xlu1 %1437, %v570_v28   ;;  %v565_v28 = vld [vmem:[%s1818_s5 + $0x70] sm:$0xff] }
  0x41   : > { %625 = vperm.xlu0 %1438, %v575_v31  }
  0x43   : > { %610 = vperm.xlu1 %1437, %v572_v30   ;;  %v566_v30 = vld [vmem:[%s1818_s5 + $0x78] sm:$0xff] }
  0x45   : > { %635 = vperm.xlu0 %1438, %v577_v33  }
  0x47   : > { %620 = vperm.xlu1 %1437, %v574_v32  }
  0x4b   : > { %630 = vperm.xlu1 %1437, %v576_v34  }
  0x4f   : > { %640 = vperm.xlu1 %1437, %v578_v35  }
  0x89   : > { %v1406_v38 = vpop.permute.xlu1 %1405 }
  0x8a   : > { %v1408_v40 = vunpack.i.h.bf16 %v1406_v38  ;;  %v1407_v41 = vunpack.i.l.bf16 %v1406_v38 }
  0x94   : > { %v1396_v39 = vpop.permute.xlu0 %1395 }
  0x95   : > { %v1398_v42 = vunpack.i.h.bf16 %v1396_v39  ;;  %v1397_v43 = vunpack.i.l.bf16 %v1396_v39 }
  0x97   : > { %v480_v44 = vsel %vm472_vm1, %v1397_v43, %v1407_v41  ;;  %v509_v45 = vsel %vm472_vm1, %v1398_v42, %v1408_v40 }
  0x98   : > { %v1321_v46 = vpack.c.bf16 %v509_v45, %v480_v44  ;;  %v1401_v47 = vpop.permute.xlu0 %1400 }
  0x99   : > { %v1403_v50 = vunpack.i.h.bf16 %v1401_v47  ;;  %v1402_v51 = vunpack.i.l.bf16 %v1401_v47 }
  0x9a   : > { %v507_v48 = vpop.permute.xlu1 %506  ;;  %1322 = vmatprep.subr.bf16.mxu0 %v1321_v46  ;;  %1349 = vmatprep.subr.bf16.mxu1 %v1321_v46 }
  0x9b   : > { %1324 = vmatpush3.bf16.msra.mxu0 %v1321_v46  ;;  %1357 = vmatpush3.bf16.msra.mxu1 %v1321_v46 }
  0x9c   : > { %v1412_v49 = vpop.permute.xlu0 %1411 }
  0x9d   : > { %v1414_v52 = vunpack.i.h.bf16 %v1412_v49  ;;  %v1413_v53 = vunpack.i.l.bf16 %v1412_v49 }
  0x9e   : > { %v488_v54 = vpop.permute.xlu1 %487 }
  0x9f   : > { %v510_v55 = vsel %vm472_vm1, %v1402_v51, %v1413_v53  ;;  %v511_v56 = vsel %vm472_vm1, %v1403_v50, %v1414_v52  ;;  %v512_v57 = vsel %vm472_vm1, %v507_v48, %v488_v54 }
  0xa0   : > { %v1325_v58 = vpack.c.bf16 %v511_v56, %v510_v55  ;;  %v1329_v59 = vpack.c.bf16 %v1610_v6, %v512_v57  ;;  %v1418_v61 = vpop.permute.xlu0 %1417 }
  0xa1   : > { %v1420_v62 = vunpack.i.h.bf16 %v1418_v61  ;;  %v1419_v63 = vunpack.i.l.bf16 %v1418_v61 }
  0xa2   : > { %v1424_v60 = vpop.permute.xlu1 %1423  ;;  %1326 = vmatprep.subr.bf16.mxu0 %v1325_v58  ;;  %1350 = vmatprep.subr.bf16.mxu1 %v1325_v58 }
  0xa3   : > { %1328 = vmatpush3.bf16.msra.mxu0 %v1325_v58  ;;  %1358 = vmatpush3.bf16.msra.mxu1 %v1325_v58  ;;  %v1426_v6 = vunpack.i.h.bf16 %v1424_v60  ;;  %v1425_v7 = vunpack.i.l.bf16 %v1424_v60 }
  0xa4   : > { %1330 = vmatprep.subr.bf16.mxu0 %v1329_v59  ;;  %1351 = vmatprep.subr.bf16.mxu1 %v1329_v59  ;;  %v545_v12 = vpop.permute.xlu0 %544 }
  0xa6   : > { %v1429_v0 = vpop.permute.xlu1 %1428 }
  0xa7   : > { %v1431_v1 = vunpack.i.h.bf16 %v1429_v0  ;;  %v1430_v2 = vunpack.i.l.bf16 %v1429_v0  ;;  %1332 = vmatpush3.bf16.msra.mxu0 %v1329_v59  ;;  %1359 = vmatpush3.bf16.msra.mxu1 %v1329_v59 }
  0xa8   : > { %1334 = vmatprep.subr.bf16.mxu0 %v1612_v9  ;;  %1352 = vmatprep.subr.bf16.mxu1 %v1612_v9 }
  0xa9   : > { %v547_v3 = vsel %vm515_vm2, %v1420_v62, %v1431_v1  ;;  %v522_v4 = vsel %vm515_vm2, %v1419_v63, %v1430_v2 }
  0xaa   : > { %v1434_v5 = vpop.permute.xlu1 %1433  ;;  %v1341_v11 = vpack.c.bf16 %v547_v3, %v522_v4 }
  0xab   : > { %v1436_v8 = vunpack.i.h.bf16 %v1434_v5  ;;  %v1435_v10 = vunpack.i.l.bf16 %v1434_v5  ;;  %1336 = vmatpush3.bf16.msra.mxu0 %v1612_v9  ;;  %1360 = vmatpush3.bf16.msra.mxu1 %v1612_v9  ;;  %v530_v9 = vpop.permute.xlu0 %529 }
  0xac   : > { %1338 = vmatprep.subr.bf16.mxu0 %v1615_v14  ;;  %1353 = vmatprep.subr.bf16.mxu1 %v1615_v14  ;;  %v550_v17 = vsel %vm515_vm2, %v545_v12, %v530_v9 }
  0xad   : > { %v548_v13 = vsel %vm515_vm2, %v1425_v7, %v1435_v10  ;;  %v549_v15 = vsel %vm515_vm2, %v1426_v6, %v1436_v8 }
  0xae   : > { %v1345_v16 = vpack.c.bf16 %v549_v15, %v548_v13  ;;  %v646_v31 = vpop.permute.xlu1 %645 }
  0xaf   : > { %1340 = vmatpush3.bf16.msra.mxu0 %v1615_v14  ;;  %1361 = vmatpush3.bf16.msra.mxu1 %v1615_v14  ;;  %v560_v14 = vld [vmem:[%s1818_s5 + $0x48] sm:$0xff]  ;;  %v651_v34 = vpop.permute.xlu0 %650 }
  0xb0   : > { %1342 = vmatprep.subr.bf16.mxu0 %v1341_v11  ;;  %1354 = vmatprep.subr.bf16.mxu1 %v1341_v11 }
  0xb2   : > { %v1762_v32 = vpop.permute.xlu1 %655 }
  0xb3   : > { %1344 = vmatpush3.bf16.msra.mxu0 %v1341_v11  ;;  %1362 = vmatpush3.bf16.msra.mxu1 %v1341_v11  ;;  %v586_v36 = vpop.permute.xlu0 %585 }
  0xb4   : > { %1346 = vmatprep.subr.bf16.mxu0 %v1345_v16  ;;  %1355 = vmatprep.subr.bf16.mxu1 %v1345_v16 }
  0xb6   : > { %v1764_v33 = vpop.permute.xlu1 %660 }
  0xb7   : > { %1348 = vmatpush3.bf16.msra.mxu0 %v1345_v16  ;;  %1363 = vmatpush3.bf16.msra.mxu1 %v1345_v16  ;;  %v596_v38 = vpop.permute.xlu0 %595 }
  0xb8   : > { %1295 = vmatprep.subr.mxu0 %v550_v17  ;;  %1356 = vmatprep.subr.mxu1 %v550_v17 }
  0xba   : > { %v591_v35 = vpop.permute.xlu1 %590 }
  0xbb   : > { %1296 = vmatpush3.msra.mxu0 %v550_v17  ;;  %1364 = vmatpush3.msra.mxu1 %v550_v17  ;;  %v606_v40 = vpop.permute.xlu0 %605 }
  0xbc   : > { %1298 = vmatmul.mubr.msk.f32.vlgmr.msra.gmra.mrb[0].mxu0 %vm663_vm0, %v552_v18  ;;  %1310 = vmatmul.mubr.msk.f32.vlgmr.msra.gmra.mrb[0].mxu1 %vm663_vm0, %v560_v14 }
  0xbd   : > { %1300 = vmatprep.mubr.msk.f32.mxu0 %vm663_vm0, %v553_v19  ;;  %1312 = vmatprep.mubr.msk.f32.mxu1 %vm663_vm0, %v561_v20 }
  0xbe   : > { %v601_v37 = vpop.permute.xlu1 %600 }
  0xbf   : > { %v616_v48 = vpop.permute.xlu0 %615 }
  0xc0   : > { %1301 = vmatmul.mubr.msk.f32.gmra.mrb[2].mxu0 %vm663_vm0, %v554_v21  ;;  %1313 = vmatmul.mubr.msk.f32.gmra.mrb[2].mxu1 %vm663_vm0, %v562_v22 }
  0xc1   : > { %1303 = vmatprep.mubr.msk.f32.mxu0 %vm663_vm0, %v555_v23  ;;  %1315 = vmatprep.mubr.msk.f32.mxu1 %vm663_vm0, %v563_v24 }
  0xc2   : > { %v611_v39 = vpop.permute.xlu1 %610 }
  0xc3   : > { %v626_v3 = vpop.permute.xlu0 %625 }
  0xc4   : > { %1304 = vmatmul.mubr.msk.f32.gmra.mrb[4].mxu0 %vm663_vm0, %v556_v25  ;;  %1316 = vmatmul.mubr.msk.f32.gmra.mrb[4].mxu1 %vm663_vm0, %v564_v26 }
  0xc5   : > { %1306 = vmatprep.mubr.msk.f32.mxu0 %vm663_vm0, %v557_v27  ;;  %1318 = vmatprep.mubr.msk.f32.mxu1 %vm663_vm0, %v565_v28 }
  0xc6   : > { %v621_v41 = vpop.permute.xlu1 %620 }
  0xc8   : > { %1307 = vmatmul.mubr.msk.f32.gmra.mrb[6].mxu0 %vm663_vm0, %v558_v29  ;;  %1319 = vmatmul.mubr.msk.f32.gmra.mrb[6].mxu1 %vm663_vm0, %v566_v30 }
  0xca   : > { %v631_v57 = vpop.permute.xlu1 %630 }
 0x18f   : > { %v1299_v42 = vpop.f32.mrb[0].mxu0  ;;  %v1311_v43 = vpop.f32.mrb[0].mxu1 }
 0x190   : > { %v784_v44 = vadd.f32 %v1299_v42, %v591_v35  ;;  %v778_v45 = vpop.f32.mrb[1].mxu0  ;;  %v818_v46 = vpop.f32.mrb[1].mxu1  ;;  %v824_v62 = vadd.f32 %v1311_v43, %v631_v57 }
 0x191   : > { %v779_v47 = vadd.f32 %v778_v45, %v586_v36  ;;  %v819_v6 = vadd.f32 %v818_v46, %v626_v3  ;;  %v641_v35 = vpop.permute.xlu1 %640  ;;  %v636_v43 = vpop.permute.xlu0 %635 }
 0x192   : > { %v1214_v49 = vmul.f32 -1.442695, %v784_v44  ;;  %v1222_v15 = vmul.f32 -1.442695, %v824_v62 }
 0x193   : > { %v1213_v50 = vmul.f32 -1.442695, %v779_v47  ;;  %v1302_v51 = vpop.f32.mrb[2].mxu0  ;;  %v1766_v52 = vpop.f32.mrb[2].mxu1  ;;  %v1221_v18 = vmul.f32 -1.442695, %v819_v6 }
 0x194   : > { %1439 = vpow2.f32 %v1214_v49  ;;  %v794_v53 = vadd.f32 %v1302_v51, %v601_v37  ;;  %v788_v54 = vpop.f32.mrb[3].mxu0  ;;  %v1768_v55 = vpop.f32.mrb[3].mxu1  ;;  %v857_v47 = vld [vmem:[%s1774_s19] sm:$0xff] }
 0x195   : > { %v789_v56 = vadd.f32 %v788_v54, %v596_v38  ;;  %1441 = vpow2.f32 %v1213_v50  ;;  %v829_v46 = vadd.f32 %v1768_v55, %v636_v43 }
 0x196   : > { %v1216_v58 = vmul.f32 -1.442695, %v794_v53  ;;  %v860_v53 = vld [vmem:[%s1774_s19 + $0x18] sm:$0xff] }
 0x197   : > { %v1215_v59 = vmul.f32 -1.442695, %v789_v56  ;;  %v1305_v60 = vpop.f32.mrb[4].mxu0  ;;  %v1317_v61 = vpop.f32.mrb[4].mxu1 }
 0x198   : > { %1443 = vpow2.f32 %v1216_v58  ;;  %v804_v63 = vadd.f32 %v1305_v60, %v611_v39  ;;  %v844_v0 = vadd.f32 %v1317_v61, %v651_v34  ;;  %v798_v1 = vpop.f32.mrb[5].mxu0  ;;  %v838_v2 = vpop.f32.mrb[5].mxu1  ;;  %v834_v39 = vadd.f32 %v1766_v52, %v641_v35 }
 0x199   : > { %v799_v4 = vadd.f32 %v798_v1, %v606_v40  ;;  %v839_v5 = vadd.f32 %v838_v2, %v646_v31  ;;  %1445 = vpow2.f32 %v1215_v59  ;;  %v858_v40 = vld [vmem:[%s1774_s19 + $0x8] sm:$0xff]  ;;  %v1223_v58 = vmul.f32 -1.442695, %v829_v46  ;;  %v859_v59 = vld [vmem:[%s1774_s19 + $0x10] sm:$0xff] }
 0x19a   : > { %v1218_v7 = vmul.f32 -1.442695, %v804_v63  ;;  %v1226_v8 = vmul.f32 -1.442695, %v844_v0  ;;  %v1224_v52 = vmul.f32 -1.442695, %v834_v39 }
 0x19b   : > { %v1217_v10 = vmul.f32 -1.442695, %v799_v4  ;;  %v1225_v11 = vmul.f32 -1.442695, %v839_v5  ;;  %v1308_v12 = vpop.f32.mrb[6].mxu0  ;;  %v1320_v13 = vpop.f32.mrb[6].mxu1 }
 0x19c   : > { %1447 = vpow2.f32 %v1218_v7  ;;  %v808_v16 = vpop.f32.mrb[7].mxu0  ;;  %v848_v9 = vpop.f32.mrb[7].mxu1  ;;  %v814_v21 = vadd.f32 %v1308_v12, %v621_v41  ;;  %v854_v28 = vadd.f32 %v1320_v13, %v1764_v33 }
 0x19d   : > { %1449 = vpow2.f32 %v1226_v8  ;;  %v809_v31 = vadd.f32 %v808_v16, %v616_v48  ;;  %v849_v37 = vadd.f32 %v848_v9, %v1762_v32 }
 0x19e   : > { %v1440_v17 = vpop.eup %1439  ;;  %1451 = vpow2.f32 %v1217_v10  ;;  %v1220_v26 = vmul.f32 -1.442695, %v814_v21  ;;  %v1228_v44 = vmul.f32 -1.442695, %v854_v28 }
 0x19f   : > { %v874_v14 = vadd.f32 1.0, %v1440_v17  ;;  %1453 = vpow2.f32 %v1225_v11  ;;  %v1442_v19 = vpop.eup %1441  ;;  %v1219_v48 = vmul.f32 -1.442695, %v809_v31  ;;  %v1227_v50 = vmul.f32 -1.442695, %v849_v37 }
 0x1a0   : > { %1455 = vpow2.f32 %v1222_v15  ;;  %v873_v20 = vadd.f32 1.0, %v1442_v19 }
 0x1a1   : > { %1457 = vrcp.f32 %v874_v14 }
 0x1a2   : > { %v1444_v22 = vpop.eup %1443  ;;  %1459 = vpow2.f32 %v1221_v18 }
 0x1a3   : > { %1461 = vrcp.f32 %v873_v20  ;;  %v876_v23 = vadd.f32 1.0, %v1444_v22  ;;  %v1446_v24 = vpop.eup %1445 }
 0x1a4   : > { %v875_v25 = vadd.f32 1.0, %v1446_v24 }
 0x1a5   : > { %1463 = vrcp.f32 %v876_v23 }
 0x1a6   : > { %v1448_v27 = vpop.eup %1447  ;;  %1465 = vrcp.f32 %v875_v25 }
 0x1a7   : > { %v1450_v29 = vpop.eup %1449  ;;  %v898_v30 = vadd.f32 1.0, %v1448_v27  ;;  %1467 = vpow2.f32 %v1220_v26 }
 0x1a8   : > { %v1452_v34 = vpop.eup %1451  ;;  %v946_v36 = vadd.f32 1.0, %v1450_v29 }
 0x1a9   : > { %v1454_v38 = vpop.eup %1453  ;;  %v897_v41 = vadd.f32 1.0, %v1452_v34 }
 0x1aa   : > { %v1456_v42 = vpop.eup %1455  ;;  %1469 = vrcp.f32 %v946_v36  ;;  %v945_v33 = vadd.f32 1.0, %v1454_v38 }
 0x1ab   : > { %v1458_v45 = vpop.eup %1457  ;;  %1471 = vrcp.f32 %v898_v30  ;;  %v922_v54 = vadd.f32 1.0, %v1456_v42 }
 0x1ac   : > { %v1460_v32 = vpop.eup %1459  ;;  %v958_v49 = vmul.f32 %v1458_v45, %v858_v40  ;;  %1473 = vrcp.f32 %v945_v33 }
 0x1ad   : > { %v1462_v51 = vpop.eup %1461  ;;  %1475 = vrcp.f32 %v897_v41  ;;  %v921_v55 = vadd.f32 1.0, %v1460_v32 }
 0x1ae   : > { %v957_v56 = vmul.f32 %v1462_v51, %v857_v47  ;;  %1477 = vpow2.f32 %v1228_v44 }
 0x1af   : > { %v1464_v57 = vpop.eup %1463  ;;  %1479 = vpow2.f32 %v1219_v48 }
 0x1b0   : > { %v960_v60 = vmul.f32 %v1464_v57, %v860_v53  ;;  %1481 = vpow2.f32 %v1227_v50  ;;  %v1466_v61 = vpop.eup %1465 }
 0x1b1   : > { %1483 = vpow2.f32 %v1224_v52  ;;  %v959_v62 = vmul.f32 %v1466_v61, %v859_v59  ;;  %v1468_v63 = vpop.eup %1467 }
 0x1b2   : > { %1485 = vrcp.f32 %v922_v54  ;;  %v900_v8 = vadd.f32 1.0, %v1468_v63 }
 0x1b3   : > { %1487 = vpow2.f32 %v1223_v58 }
 0x1b4   : > { %v1470_v0 = vpop.eup %1469  ;;  %1489 = vrcp.f32 %v921_v55 }
 0x1b5   : > { %v1472_v1 = vpop.eup %1471  ;;  %v962_v2 = vmax.f32 %v1470_v0, 0.0 }
 0x1b6   : > { %v1474_v3 = vpop.eup %1473 }
 0x1b7   : > { %v1476_v4 = vpop.eup %1475  ;;  %v966_v5 = vmul.f32 %v1472_v1, %v962_v2  ;;  %v961_v6 = vmax.f32 %v1474_v3, 0.0 }
 0x1b8   : > { %v1478_v7 = vpop.eup %1477 }
 0x1b9   : > { %v1480_v10 = vpop.eup %1479  ;;  %v970_v11 = vsub.f32 %v958_v49, %v966_v5  ;;  %v965_v12 = vmul.f32 %v1476_v4, %v961_v6  ;;  %v948_v13 = vadd.f32 1.0, %v1478_v7 }
 0x1ba   : > { %v1482_v15 = vpop.eup %1481  ;;  %v899_v16 = vadd.f32 1.0, %v1480_v10 }
 0x1bb   : > { %v1484_v9 = vpop.eup %1483  ;;  %v974_v17 = vmax.f32 %v970_v11, 0.0  ;;  %982 = vst [vmem:[%s1788_s22 + $0x8] sm:$0xff] %v970_v11  ;;  %v969_v18 = vsub.f32 %v957_v56, %v965_v12  ;;  %1491 = vrcp.f32 %v948_v13  ;;  %v947_v14 = vadd.f32 1.0, %v1482_v15 }
 0x1bc   : > { %v1486_v19 = vpop.eup %1485  ;;  %1493 = vrcp.f32 %v900_v8  ;;  %v924_v24 = vadd.f32 1.0, %v1484_v9 }
 0x1bd   : > { %v1488_v20 = vpop.eup %1487  ;;  %v978_v21 = vmul.f32 %v1486_v19, %v974_v17  ;;  %v973_v22 = vmax.f32 %v969_v18, 0.0  ;;  %981 = vst [vmem:[%s1788_s22] sm:$0xff] %v969_v18  ;;  %1495 = vrcp.f32 %v947_v14 }
 0x1be   : > { %v1490_v23 = vpop.eup %1489  ;;  %1497 = vrcp.f32 %v899_v16  ;;  %v923_v26 = vadd.f32 1.0, %v1488_v20 }
 0x1bf   : > { %986 = vst [vmem:[%s1795_s25 + $0x8] sm:$0xff] %v978_v21  ;;  %v977_v25 = vmul.f32 %v1490_v23, %v973_v22  ;;  %1499 = vrcp.f32 %v924_v24 }
 0x1c0   : > { %1501 = vrcp.f32 %v923_v26 }
 0x1c1   : > { %985 = vst [vmem:[%s1795_s25] sm:$0xff] %v977_v25 }
 0x1c5   : > { %v1492_v27 = vpop.eup %1491 }
 0x1c6   : > { %v1494_v28 = vpop.eup %1493  ;;  %v964_v29 = vmax.f32 %v1492_v27, 0.0 }
 0x1c7   : > { %v1496_v30 = vpop.eup %1495 }
 0x1c8   : > { %v968_v31 = vmul.f32 %v1494_v28, %v964_v29  ;;  %v963_v34 = vmax.f32 %v1496_v30, 0.0  ;;  %v1498_v35 = vpop.eup %1497 }
 0x1c9   : > { %v1500_v40 = vpop.eup %1499 }
 0x1ca   : > { %v972_v36 = vsub.f32 %v960_v60, %v968_v31  ;;  %v967_v37 = vmul.f32 %v1498_v35, %v963_v34  ;;  %v1502_v43 = vpop.eup %1501 }
 0x1cc   : > { %v976_v38 = vmax.f32 %v972_v36, 0.0  ;;  %984 = vst [vmem:[%s1788_s22 + $0x18] sm:$0xff] %v972_v36  ;;  %v971_v39 = vsub.f32 %v959_v62, %v967_v37 }
 0x1ce   : > { %v980_v41 = vmul.f32 %v1500_v40, %v976_v38  ;;  %v975_v42 = vmax.f32 %v971_v39, 0.0  ;;  %983 = vst [vmem:[%s1788_s22 + $0x10] sm:$0xff] %v971_v39 }
 0x1d0   : > { %988 = vst [vmem:[%s1795_s25 + $0x18] sm:$0xff] %v980_v41  ;;  %v979_v33 = vmul.f32 %v1502_v43, %v975_v42 }
 0x1d2   : > { %987 = vst [vmem:[%s1795_s25 + $0x10] sm:$0xff] %v979_v33 }
 0x1d3 PF: > { %s19_s29 = sadd.s32 1, %s1525_s29   ;;  %s1822_s27 = smov %s1521_s28 }
 0x1d4   : > { %p16_p5 = scmp.ge.s32.totalorder %s19_s29, 4   ;;  %s1823_s28 = smov %s1825_s30 }
 0x1d6   :  { %18 = sbr.rel (!%p16_p5) target bundleno = 2 (0x2), region = 104 }

</bundles_post_ra>
